<compile_context>
chip_gen: v7x
topology: tpu7x:2x2x1
jax: 0.10.0
libtpu: 0.0.40
codegen_flags: <defaults>
</compile_context>

<pallas_src>
import functools

import jax
import jax.numpy as jnp
from jax.experimental import pallas as pl
from jax.experimental.pallas import tpu as pltpu


def _kernel(gt_ref, out3d_ref, t2d_ref, msk_ref, partial_ref):
    # ---- L_recon partial over this tile: sum((gt - out3d)^2) ------------------
    gt = gt_ref[...].astype(jnp.float32)                    # (B, tn)   N on lanes
    d = gt - out3d_ref[...].astype(jnp.float32)
    s_recon = jnp.sum(d * d)

    # ---- L_sk partial over this tile: sum(((gt - t2d) * msk)^2) ---------------
    # t2d arrives in its native HBM layout (B, tn, V) via a contiguous DMA; relayout
    # to lane-dense (B, V, tn) here on the XLU so the VPU math runs at full 128-lane
    # width.  Mask is already lane-dense int8 {0,1} from the wrapper.
    t2d = jnp.transpose(t2d_ref[...].astype(jnp.float32), (0, 2, 1))   # (B, V, tn)
    mskf = msk_ref[...].astype(jnp.float32)                 # (B, V, tn)
    ds = (gt[:, None, :] - t2d) * mskf                      # == gt*m - t2d*m, m in {0,1}
    s_sk = jnp.sum(ds * ds)

    # ---- lane-dense per-block partials (row 0 = recon, row 1 = sketch) --------
    row = jax.lax.broadcasted_iota(jnp.int32, partial_ref.shape, 1)    # (1, 2, 128)
    partial_ref[...] = jnp.where(row == 0, s_recon, s_sk)


def _round_up(x, m):
    return ((x + m - 1) // m) * m


def _vmem_bytes_per_tn(b, v):
    """Estimated VMEM bytes per unit of tn: double-buffered inputs + kernel temps."""
    t2d_stage = 2 * b * 128 * 4                      # (B,tn,V) f32 staging, V lane-padded to 128
    msk_stage = 2 * b * max(_round_up(v, 32), 32)    # (B,V,tn) int8, V sublane-padded to 32
    gt_out3d = 2 * 2 * max(b, 8) * 4                 # two (B,tn) f32 inputs, B sublane-padded
    temps = 3 * b * max(v, 8) * 4                    # transposed t2d, f32 mask, ds
    return t2d_stage + msk_stage + gt_out3d + temps


def _plan_tiles(n, max_tn, b, v, vmem_budget_bytes):
    """Return (n_pad, tn): n_pad = n rounded up to 128, tn a 128-multiple divisor."""
    budget_tn = max(128, vmem_budget_bytes // _vmem_bytes_per_tn(b, v))
    max_tn = max(128, min(max_tn, budget_tn))
    max_tn -= max_tn % 128
    n_pad = _round_up(n, 128)
    if n_pad <= max_tn:
        # Prefer >= 2 grid steps so ("parallel",) can split across v7x's two TensorCores.
        if n_pad >= 256 and n_pad % 256 == 0:
            return n_pad, n_pad // 2
        return n_pad, n_pad
    for t in range(max_tn, 127, -128):
        if n_pad % t == 0:
            return n_pad, t
    return n_pad, 128   # 128 always divides n_pad


_VMEM_BUDGET_BYTES = 24 * 1024 * 1024    # keep double-buffered working set v7x-safe (64 MiB phys)
_VMEM_LIMIT_BYTES = 40 * 1024 * 1024     # raise scoped limit (v5e default 16 MiB), < v7x physical


@functools.partial(jax.jit, static_argnames=("recon_weight", "sketch_weight", "max_tn"))
def recon_loss_pallas(gt_3d_occ, output_3d_occ, total_2d_occ, transformed_points, h,
                      *, recon_weight, sketch_weight, max_tn=8192):
    B, N = gt_3d_occ.shape
    V = total_2d_occ.shape[-1]
    n_pad, tn = _plan_tiles(N, max_tn, B, V, _VMEM_BUDGET_BYTES)
    grid_n = n_pad // tn

    # Precompute the {0,1} mask as int8 in lane-dense (B, V, N) layout.  This fuses
    # with the (unavoidable) read of transformed_points for the z-slice, removes the
    # f32 z tensor from the kernel's HBM traffic, and eliminates the `h` scalar.
    tz = transformed_points[..., 2]                                            # (B, N, V)
    msk = jnp.transpose(((tz > -h) & (tz <= h)).astype(jnp.int8), (0, 2, 1))   # (B, V, N)

    gt, out3d, t2d = gt_3d_occ, output_3d_occ, total_2d_occ
    if n_pad != N:
        # Zero-padding is loss-neutral: padded gt == out3d == 0 and padded mask == 0.
        pad = n_pad - N
        gt = jnp.pad(gt, ((0, 0), (0, pad)))
        out3d = jnp.pad(out3d, ((0, 0), (0, pad)))
        t2d = jnp.pad(t2d, ((0, 0), (0, pad), (0, 0)))
        msk = jnp.pad(msk, ((0, 0), (0, 0), (0, pad)))

    bytes_accessed = int(
        (gt.size + out3d.size) * gt.dtype.itemsize
        + t2d.size * t2d.dtype.itemsize
        + msk.size                                   # int8: 1 byte/elem
        + grid_n * 2 * 128 * 4)
    cost = pl.CostEstimate(flops=3 * B * n_pad + 6 * B * n_pad * V,
                           transcendentals=0,
                           bytes_accessed=bytes_accessed)

    partials = pl.pallas_call(
        _kernel,
        out_shape=jax.ShapeDtypeStruct((grid_n, 2, 128), jnp.float32),
        grid=(grid_n,),
        in_specs=[
            pl.BlockSpec((B, tn), lambda i: (0, i)),         # gt_3d_occ      (B, N)
            pl.BlockSpec((B, tn), lambda i: (0, i)),         # output_3d_occ  (B, N)
            pl.BlockSpec((B, tn, V), lambda i: (0, i, 0)),   # total_2d_occ   (B, N, V) native
            pl.BlockSpec((B, V, tn), lambda i: (0, 0, i)),   # int8 mask      (B, V, N) lane-dense
        ],
        out_specs=pl.BlockSpec((1, 2, 128), lambda i: (i, 0, 0)),
        compiler_params=pltpu.CompilerParams(
            dimension_semantics=("parallel",),
            vmem_limit_bytes=_VMEM_LIMIT_BYTES),
        cost_estimate=cost,
    )(gt, out3d, t2d, msk)

    # Tree-sum the tiny per-block partials, then apply mean + loss weights.
    sums = jnp.sum(partials[:, :, 0], axis=0)                 # (2,)
    l_recon = sums[0] * (float(recon_weight) / (B * N))
    l_sk = sums[1] * (float(sketch_weight) / (B * N * V))
    return {"L_recon": l_recon, "L_sk": l_sk}


def recon_loss_ref(gt_3d_occ, output_3d_occ, total_2d_occ, transformed_points, h,
                   *, recon_weight, sketch_weight):
    tz = transformed_points[..., 2]
    msk = ((tz > -h) & (tz <= h)).astype(jnp.float32)
    l_recon = jnp.mean((gt_3d_occ - output_3d_occ) ** 2)
    gt_rep = gt_3d_occ[..., None]
    l_sk = jnp.mean((gt_rep * msk - total_2d_occ * msk) ** 2)
    return {"L_recon": recon_weight * l_recon, "L_sk": sketch_weight * l_sk}


def _run_case(key, B, N, V, h, weights, max_tn):
    k1, k2, k3, k4 = jax.random.split(key, 4)
    gt_3d_occ = (jax.random.uniform(k1, (B, N)) > 0.5).astype(jnp.float32)
    output_3d_occ = jax.random.uniform(k2, (B, N), dtype=jnp.float32)
    total_2d_occ = jax.random.uniform(k3, (B, N, V), dtype=jnp.float32)
    transformed_points = jax.random.uniform(
        k4, (B, N, V, 3), dtype=jnp.float32, minval=-1.0, maxval=1.0)

    res = recon_loss_pallas(
        gt_3d_occ, output_3d_occ, total_2d_occ, transformed_points, h,
        recon_weight=weights["recon_weight"], sketch_weight=weights["sketch_weight"],
        max_tn=max_tn)
    jax.block_until_ready(res)

    ref = recon_loss_ref(
        gt_3d_occ, output_3d_occ, total_2d_occ, transformed_points, h,
        recon_weight=weights["recon_weight"], sketch_weight=weights["sketch_weight"])

    assert jnp.allclose(res["L_recon"], ref["L_recon"], rtol=1e-5, atol=1e-6), (
        res["L_recon"], ref["L_recon"])
    assert jnp.allclose(res["L_sk"], ref["L_sk"], rtol=1e-5, atol=1e-6), (
        res["L_sk"], ref["L_sk"])


if __name__ == "__main__":
    weights = {"recon_weight": 1.0, "sketch_weight": 0.5}
    key = jax.random.PRNGKey(0)
    k_a, k_b, k_c = jax.random.split(key, 3)

    # Whole padded axis fits one block -> split into 2 blocks (v7x dual-TC path).
    _run_case(k_a, B=2, N=256, V=8, h=0.5, weights=weights, max_tn=8192)
    # Forced small tiles -> multi-block parallel partial-sum path (grid_n = 4).
    _run_case(k_b, B=2, N=512, V=8, h=0.5, weights=weights, max_tn=128)
    # N not a multiple of 128 -> exercises the loss-neutral zero-padding path.
    _run_case(k_c, B=2, N=200, V=8, h=0.5, weights=weights, max_tn=8192)

    print("KERNEL_OK")
</pallas_src>

<mosaic_0001>
module attributes {stable_mosaic.version = 11 : i64} {
  func.func @_kernel(%arg0: i32, %arg1: memref<2x128xf32, #tpu.memory_space<vmem>>, %arg2: memref<2x128xf32, #tpu.memory_space<vmem>>, %arg3: memref<2x128x8xf32, #tpu.memory_space<vmem>>, %arg4: memref<2x8x128xi8, #tpu.memory_space<vmem>>, %arg5: memref<1x2x128xf32, #tpu.memory_space<vmem>>) attributes {dimension_semantics = [#tpu.dimension_semantics<parallel>], iteration_bounds = array<i64: 2>, scalar_prefetch = 0 : i64, scratch_operands = 0 : i64, tpu.core_type = #tpu.core_type<tc>, window_params = [{transform_indices = @transform_0, window_bounds = array<i64: 2, 128>}, {transform_indices = @transform_1, window_bounds = array<i64: 2, 128>}, {transform_indices = @transform_2, window_bounds = array<i64: 2, 128, 8>}, {transform_indices = @transform_3, window_bounds = array<i64: 2, 8, 128>}, {transform_indices = @transform_4, window_bounds = array<i64: 1, 2, 128>}]} {
    %c0 = arith.constant 0 : index
    %c0_0 = arith.constant 0 : index
    %0 = vector.load %arg1[%c0, %c0_0] : memref<2x128xf32, #tpu.memory_space<vmem>>, vector<2x128xf32>
    %c0_1 = arith.constant 0 : index
    %c0_2 = arith.constant 0 : index
    %1 = vector.load %arg2[%c0_1, %c0_2] : memref<2x128xf32, #tpu.memory_space<vmem>>, vector<2x128xf32>
    %2 = arith.subf %0, %1 : vector<2x128xf32>
    %3 = arith.mulf %2, %2 : vector<2x128xf32>
    %4 = vector.shape_cast %3 : vector<2x128xf32> to vector<1x2x128xf32>
    %cst = arith.constant dense<0.000000e+00> : vector<1xf32>
    %5 = vector.multi_reduction <add>, %4, %cst [1, 2] : vector<1x2x128xf32> to vector<1xf32>
    %6 = vector.shape_cast %5 : vector<1xf32> to vector<1x1x1xf32>
    %7 = vector.extract %6[0, 0, 0] : f32 from vector<1x1x1xf32>
    %c0_3 = arith.constant 0 : index
    %c0_4 = arith.constant 0 : index
    %c0_5 = arith.constant 0 : index
    %8 = vector.load %arg3[%c0_3, %c0_4, %c0_5] : memref<2x128x8xf32, #tpu.memory_space<vmem>>, vector<2x128x8xf32>
    %9 = tpu.transpose %8, [0, 2, 1] : vector<2x128x8xf32> -> vector<2x8x128xf32>
    %c0_6 = arith.constant 0 : index
    %c0_7 = arith.constant 0 : index
    %c0_8 = arith.constant 0 : index
    %10 = vector.load %arg4[%c0_6, %c0_7, %c0_8] : memref<2x8x128xi8, #tpu.memory_space<vmem>>, vector<2x8x128xi8>
    %11 = arith.sitofp %10 : vector<2x8x128xi8> to vector<2x8x128xf32>
    %12 = vector.shape_cast %0 : vector<2x128xf32> to vector<2x1x128xf32>
    %13 = vector.broadcast %12 : vector<2x1x128xf32> to vector<2x8x128xf32>
    %14 = arith.subf %13, %9 : vector<2x8x128xf32>
    %15 = arith.mulf %14, %11 : vector<2x8x128xf32>
    %16 = arith.mulf %15, %15 : vector<2x8x128xf32>
    %17 = vector.shape_cast %16 : vector<2x8x128xf32> to vector<1x2x8x128xf32>
    %cst_9 = arith.constant dense<0.000000e+00> : vector<1xf32>
    %18 = vector.multi_reduction <add>, %17, %cst_9 [1, 2, 3] : vector<1x2x8x128xf32> to vector<1xf32>
    %19 = vector.shape_cast %18 : vector<1xf32> to vector<1x1x1x1xf32>
    %20 = vector.extract %19[0, 0, 0, 0] : f32 from vector<1x1x1x1xf32>
    %21 = tpu.iota {dimensions = array<i32: 1>} : vector<1x2x128xi32>
    %c0_i32 = arith.constant 0 : i32
    %22 = vector.broadcast %c0_i32 : i32 to vector<1x2x128xi32>
    %23 = arith.cmpi eq, %21, %22 : vector<1x2x128xi32>
    %24 = vector.broadcast %7 : f32 to vector<1x2x128xf32>
    %25 = vector.broadcast %20 : f32 to vector<1x2x128xf32>
    %26 = arith.select %23, %24, %25 : vector<1x2x128xi1>, vector<1x2x128xf32>
    %c0_10 = arith.constant 0 : index
    %c0_11 = arith.constant 0 : index
    %c0_12 = arith.constant 0 : index
    %27 = vector.load %arg5[%c0_10, %c0_11, %c0_12] : memref<1x2x128xf32, #tpu.memory_space<vmem>>, vector<1x2x128xf32>
    tpu.vector_store %arg5[%c0_10, %c0_11, %c0_12], %26 {strides = array<i32>} : memref<1x2x128xf32, #tpu.memory_space<vmem>>, vector<1x2x128xf32>,
    return
  }
  func.func @transform_0(%arg0: i32) -> (i32, i32) {
    %c0_i32 = arith.constant 0 : i32
    %c0_i32_0 = arith.constant 0 : i32
    return %c0_i32, %arg0 : i32, i32
  }
  func.func @transform_1(%arg0: i32) -> (i32, i32) {
    %c0_i32 = arith.constant 0 : i32
    %c0_i32_0 = arith.constant 0 : i32
    return %c0_i32, %arg0 : i32, i32
  }
  func.func @transform_2(%arg0: i32) -> (i32, i32, i32) {
    %c0_i32 = arith.constant 0 : i32
    %c0_i32_0 = arith.constant 0 : i32
    %c0_i32_1 = arith.constant 0 : i32
    return %c0_i32, %arg0, %c0_i32_0 : i32, i32, i32
  }
  func.func @transform_3(%arg0: i32) -> (i32, i32, i32) {
    %c0_i32 = arith.constant 0 : i32
    %c0_i32_0 = arith.constant 0 : i32
    %c0_i32_1 = arith.constant 0 : i32
    return %c0_i32, %c0_i32_0, %arg0 : i32, i32, i32
  }
  func.func @transform_4(%arg0: i32) -> (i32, i32, i32) {
    %c0_i32 = arith.constant 0 : i32
    %c0_i32_0 = arith.constant 0 : i32
    %c0_i32_1 = arith.constant 0 : i32
    return %arg0, %c0_i32, %c0_i32_0 : i32, i32, i32
  }
}

</mosaic_0001>

<bundles_post_ra>
// kernel: recon_loss_pallas.1
= control target key start
LH: loop header
LB: loop body
LE: loop exit
PB: predicated region body
PF: predicated region fallthrough
CT: control target
= control target key end

     0   :  { %s822_s15 = smov 0   ;;  %s824_s16 = smov 0   ;;  %s1006_s0 = inlined_call_operand.vmem [shape: f32[2,256], index: 0, kind: input, shape index: {}]   ;;  %s1007_s1 = inlined_call_operand.vmem [shape: f32[2,256], index: 1, kind: input, shape index: {}]   ;;  %s1008_s2 = inlined_call_operand.vmem [shape: f32[2,256,8], index: 2, kind: input, shape index: {}]   ;;  %s1009_s3 = inlined_call_operand.vmem [shape: s8[2,8,256], index: 3, kind: input, shape index: {}]   ;;  %s1010_s4 = inlined_call_operand.vmem [shape: f32[2,2,128], index: 4, kind: output, shape index: {}]  }
   0x1   :  { %s826_s17 = smov 0  }
   0x2 LB: > { %s721_s18 = sadd.s32 4294967295, %s794_s17   ;;  %s839_s19 = sadd.s32 1, %s794_s17   ;;  %s794_s17 = sphi %s826_s17, %s1014_s17   ;;  %s790_s16 = sphi %s824_s16, %s1013_s16   ;;  %s786_s15 = sphi %s822_s15, %s1012_s15  }
   0x3   : > { %s70_s20 = ssub.s32 %s794_s17, %s839_s19  ;;  %s73_s21 = sadd.s32 1, %s790_s16 }
   0x4   : > { %p71_p0 = scmp.eq.s32.totalorder %s70_s20, 0  ;;  %p80_p1 = scmp.ne.s32.totalorder %s790_s16, %s786_s15 }
   0x5   : > { %p81_p2 = scmp.eq.s32.totalorder %s794_s17, 0  ;;  %p724_p4 = scmp.ge.s32.totalorder %s794_s17, 2 }
   0x6   : > { %s848_s22 = scalar_select %p71_p0, %s790_s16, %s73_s21  }
   0x7   : > { %p850_p3 = por %p81_p2, %p80_p1  ;;  %158 = sbr.rel (%p724_p4) target bundleno = 41 (0x29), region = 16 }
   0xe   : > { %175 = sbr.rel (!%p850_p3) target bundleno = 34 (0x22), region = 28  ;;  %s177_s24 = sand.u32 (%p850_p3), 1, %s790_s16  }
   0xf   : > { %s738_s25 = sshll.u32 (%p850_p3), %s794_s17, 7  ;;  %s725_s26 = sshll.u32 (%p850_p3), %s177_s24, 8 }
  0x10   : > { %s862_s29 = scalar_lea.vmem (%p850_p3), %s1008_s2, %s738_s25  ;;  %s867_s30 = scalar_lea.vmem (%p850_p3), [#allocation2], %s725_s26 }
  0x11   : > { %v272_v0 = vld [vmem:[%s862_s29] sm:$0xff] (%p850_p3)  ;;  %v274_v1 = vld [vmem:[%s862_s29 + $0x8] sm:$0xff] (%p850_p3)  ;;  %v276_v2 = vld [vmem:[%s862_s29 + $0x10] sm:$0xff] (%p850_p3) }
  0x12   : > { %273 = vst [vmem:[%s867_s30] sm:$0xff] (%p850_p3), %v272_v0  ;;  %275 = vst [vmem:[%s867_s30 + $0x8] sm:$0xff] (%p850_p3), %v274_v1  ;;  %v278_v3 = vld [vmem:[%s862_s29 + $0x18] sm:$0xff] (%p850_p3)  ;;  %v280_v4 = vld [vmem:[%s862_s29 + $0x20] sm:$0xff] (%p850_p3) }
  0x13   : > { %277 = vst [vmem:[%s867_s30 + $0x10] sm:$0xff] (%p850_p3), %v276_v2  ;;  %v282_v5 = vld [vmem:[%s862_s29 + $0x28] sm:$0xff] (%p850_p3)  ;;  %279 = vst [vmem:[%s867_s30 + $0x18] sm:$0xff] (%p850_p3), %v278_v3  ;;  %v284_v6 = vld [vmem:[%s862_s29 + $0x30] sm:$0xff] (%p850_p3) }
  0x14   : > { %281 = vst [vmem:[%s867_s30 + $0x20] sm:$0xff] (%p850_p3), %v280_v4  ;;  %283 = vst [vmem:[%s867_s30 + $0x28] sm:$0xff] (%p850_p3), %v282_v5  ;;  %v286_v7 = vld [vmem:[%s862_s29 + $0x38] sm:$0xff] (%p850_p3)  ;;  %v288_v8 = vld [vmem:[%s862_s29 + $0x40] sm:$0xff] (%p850_p3) }
  0x15   : > { %285 = vst [vmem:[%s867_s30 + $0x30] sm:$0xff] %v284_v6  ;;  %287 = vst [vmem:[%s867_s30 + $0x38] sm:$0xff] %v286_v7  ;;  %v290_v9 = vld [vmem:[%s862_s29 + $0x48] sm:$0xff]  ;;  %v292_v10 = vld [vmem:[%s862_s29 + $0x50] sm:$0xff] }
  0x16   : > { %289 = vst [vmem:[%s867_s30 + $0x40] sm:$0xff] %v288_v8  ;;  %v294_v11 = vld [vmem:[%s862_s29 + $0x58] sm:$0xff]  ;;  %291 = vst [vmem:[%s867_s30 + $0x48] sm:$0xff] %v290_v9  ;;  %v296_v12 = vld [vmem:[%s862_s29 + $0x60] sm:$0xff] }
  0x17   : > { %293 = vst [vmem:[%s867_s30 + $0x50] sm:$0xff] %v292_v10  ;;  %295 = vst [vmem:[%s867_s30 + $0x58] sm:$0xff] %v294_v11  ;;  %v298_v13 = vld [vmem:[%s862_s29 + $0x68] sm:$0xff]  ;;  %v300_v14 = vld [vmem:[%s862_s29 + $0x70] sm:$0xff] }
  0x18   : > { %297 = vst [vmem:[%s867_s30 + $0x60] sm:$0xff] %v296_v12  ;;  %299 = vst [vmem:[%s867_s30 + $0x68] sm:$0xff] %v298_v13  ;;  %v302_v15 = vld [vmem:[%s862_s29 + $0x78] sm:$0xff]  ;;  %v304_v16 = vld [vmem:[%s862_s29 + $0x100] sm:$0xff] }
  0x19   : > { %301 = vst [vmem:[%s867_s30 + $0x70] sm:$0xff] %v300_v14  ;;  %v306_v17 = vld [vmem:[%s862_s29 + $0x108] sm:$0xff]  ;;  %303 = vst [vmem:[%s867_s30 + $0x78] sm:$0xff] %v302_v15  ;;  %v308_v18 = vld [vmem:[%s862_s29 + $0x110] sm:$0xff] }
  0x1a   : > { %305 = vst [vmem:[%s867_s30 + $0x80] sm:$0xff] %v304_v16  ;;  %307 = vst [vmem:[%s867_s30 + $0x88] sm:$0xff] %v306_v17  ;;  %v310_v19 = vld [vmem:[%s862_s29 + $0x118] sm:$0xff]  ;;  %v312_v20 = vld [vmem:[%s862_s29 + $0x120] sm:$0xff] }
  0x1b   : > { %309 = vst [vmem:[%s867_s30 + $0x90] sm:$0xff] %v308_v18  ;;  %311 = vst [vmem:[%s867_s30 + $0x98] sm:$0xff] %v310_v19  ;;  %v314_v21 = vld [vmem:[%s862_s29 + $0x128] sm:$0xff]  ;;  %v316_v22 = vld [vmem:[%s862_s29 + $0x130] sm:$0xff] }
  0x1c   : > { %313 = vst [vmem:[%s867_s30 + $0xa0] sm:$0xff] %v312_v20  ;;  %v318_v23 = vld [vmem:[%s862_s29 + $0x138] sm:$0xff]  ;;  %315 = vst [vmem:[%s867_s30 + $0xa8] sm:$0xff] %v314_v21  ;;  %v320_v24 = vld [vmem:[%s862_s29 + $0x140] sm:$0xff] }
  0x1d   : > { %317 = vst [vmem:[%s867_s30 + $0xb0] sm:$0xff] %v316_v22  ;;  %319 = vst [vmem:[%s867_s30 + $0xb8] sm:$0xff] %v318_v23  ;;  %v322_v25 = vld [vmem:[%s862_s29 + $0x148] sm:$0xff]  ;;  %v324_v26 = vld [vmem:[%s862_s29 + $0x150] sm:$0xff] }
  0x1e   : > { %321 = vst [vmem:[%s867_s30 + $0xc0] sm:$0xff] %v320_v24  ;;  %323 = vst [vmem:[%s867_s30 + $0xc8] sm:$0xff] %v322_v25  ;;  %v326_v27 = vld [vmem:[%s862_s29 + $0x158] sm:$0xff]  ;;  %v328_v28 = vld [vmem:[%s862_s29 + $0x160] sm:$0xff] }
  0x1f   : > { %325 = vst [vmem:[%s867_s30 + $0xd0] sm:$0xff] %v324_v26  ;;  %v330_v29 = vld [vmem:[%s862_s29 + $0x168] sm:$0xff]  ;;  %327 = vst [vmem:[%s867_s30 + $0xd8] sm:$0xff] %v326_v27  ;;  %v332_v30 = vld [vmem:[%s862_s29 + $0x170] sm:$0xff] }
  0x20   : > { %329 = vst [vmem:[%s867_s30 + $0xe0] sm:$0xff] %v328_v28  ;;  %331 = vst [vmem:[%s867_s30 + $0xe8] sm:$0xff] %v330_v29  ;;  %v334_v31 = vld [vmem:[%s862_s29 + $0x178] sm:$0xff] }
  0x21   : > { %333 = vst [vmem:[%s867_s30 + $0xf0] sm:$0xff] %v332_v30  ;;  %335 = vst [vmem:[%s867_s30 + $0xf8] sm:$0xff] %v334_v31 }
  0x22 PF: > { %341 = sbr.rel (!%p850_p3) target bundleno = 41 (0x29), region = 66  ;;  %s343_s5 = sand.u32 (%p850_p3), 1, %s790_s16  }
  0x23   : > { %s729_s6 = sshll.u32 (%p850_p3), %s794_s17, 1  ;;  %s728_s7 = sshll.u32 (%p850_p3), %s343_s5, 2 }
  0x24   : > { %s347_s10 = scalar_lea.vmem (%p850_p3), %s1009_s3, %s729_s6  ;;  %s345_s11 = scalar_lea.vmem (%p850_p3), [#allocation3], %s728_s7 }
  0x25   : > { %v363_v32 = vld [vmem:[%s347_s10] sm:$0x3] (%p850_p3)  ;;  %v365_v33 = vld [vmem:[%s347_s10 + $0x4] sm:$0x3] (%p850_p3) }
  0x26   : > { %364 = vst [vmem:[%s345_s11] sm:$0x3] (%p850_p3), %v363_v32  ;;  %366 = vst [vmem:[%s345_s11 + $0x2] sm:$0x3] (%p850_p3), %v365_v33 }
  0x29 PF: > { %p730_p5 = scmp.ge.s32.totalorder %s794_s17, 1  ;;  %p384_p6 = scmp.lt.s32.totalorder %s794_s17, 3 }
  0x2b   : > { %p385_p7 = pnand %p730_p5, %p384_p6 }
  0x2c   : > { %s391_s12 = sand.u32 (!%p385_p7), 1, %s786_s15   ;;  %p434_p8 = scmp.lt.s32.totalorder (!%p385_p7), %s721_s18, 1  ;;  %vm451_vm0 = vcmask (!%p385_p7), 1041408   ;;  %v796_v6 = vmov (!%p385_p7), 1966171168   ;;  %v568_v8 = vlaneseq (!%p385_p7) }
  0x2d   : > { %388 = sbr.rel (%p385_p7) target bundleno = 393 (0x189), region = 100  ;;  %s731_s13 = sshll.u32 (!%p385_p7), %s391_s12, 8  ;;  %v566_v7 = vunpack.c.l.s4 (!%p385_p7), %v796_v6 }
  0x2e   : > { %s942_s14 = scalar_lea.vmem (!%p385_p7), [#allocation2], %s731_s13  ;;  %v569_v11 = vshrl.u32 (!%p385_p7), %v568_v8, 7  ;;  %s732_s17 = sshll.u32 (!%p385_p7), %s391_s12, 2 }
  0x2f   : > { %v478_v34 = vld [vmem:[%s942_s14 + $0x80] sm:$0xff] (!%p385_p7)  ;;  %v479_v36 = vld [vmem:[%s942_s14 + $0x88] sm:$0xff] (!%p385_p7)  ;;  %v480_v38 = vld [vmem:[%s942_s14 + $0x90] sm:$0xff] (!%p385_p7)  ;;  %v567_v10 = vunpack.c.0.s8 (!%p385_p7), %v566_v7 }
  0x30   : > { %v462_v35 = vld [vmem:[%s942_s14] sm:$0xff] (!%p385_p7)  ;;  %526 = vxpose.xlu1.b32.start [1/16] (narrow) (!%p385_p7), %v478_v34, 8  ;;  %v463_v37 = vld [vmem:[%s942_s14 + $0x8] sm:$0xff] (!%p385_p7)  ;;  %v464_v39 = vld [vmem:[%s942_s14 + $0x10] sm:$0xff] (!%p385_p7)  ;;  %v589_v17 = vsub.s32 (!%p385_p7), 0, %v569_v11  ;;  %vm615_vm1 = vcmp.eq.s32.totalorder (!%p385_p7), %v569_v11, 0 }
  0x31   : > { %494 = vxpose.xlu0.b32.start [1/16] (narrow) (!%p385_p7), %v462_v35, 8  ;;  %v481_v40 = vld [vmem:[%s942_s14 + $0x98] sm:$0xff] (!%p385_p7)  ;;  %v482_v42 = vld [vmem:[%s942_s14 + $0xa0] sm:$0xff] (!%p385_p7)  ;;  %v483_v44 = vld [vmem:[%s942_s14 + $0xa8] sm:$0xff] (!%p385_p7)  ;;  %v570_v12 = vsub.s32 (!%p385_p7), %v567_v10, %v569_v11 }
  0x32   : > { %v465_v41 = vld [vmem:[%s942_s14 + $0x18] sm:$0xff] (!%p385_p7)  ;;  %v466_v43 = vld [vmem:[%s942_s14 + $0x20] sm:$0xff] (!%p385_p7)  ;;  %v467_v45 = vld [vmem:[%s942_s14 + $0x28] sm:$0xff] (!%p385_p7) }
  0x33   : > { %v484_v46 = vld [vmem:[%s942_s14 + $0xb0] sm:$0xff] (!%p385_p7)  ;;  %v485_v48 = vld [vmem:[%s942_s14 + $0xb8] sm:$0xff] (!%p385_p7)  ;;  %v486_v50 = vld [vmem:[%s942_s14 + $0xc0] sm:$0xff] (!%p385_p7) }
  0x34   : > { %527 = vxpose.xlu1.b32.cont [2/16] (narrow) %v479_v36, 8  ;;  %v468_v47 = vld [vmem:[%s942_s14 + $0x30] sm:$0xff]  ;;  %v469_v49 = vld [vmem:[%s942_s14 + $0x38] sm:$0xff]  ;;  %v470_v51 = vld [vmem:[%s942_s14 + $0x40] sm:$0xff]  ;;  %s1016_s18 = smov (!%p434_p8, %s721_s18), 1 }
  0x35   : > { %495 = vxpose.xlu0.b32.cont [2/16] (narrow) %v463_v37, 8  ;;  %v487_v52 = vld [vmem:[%s942_s14 + $0xc8] sm:$0xff]  ;;  %v488_v54 = vld [vmem:[%s942_s14 + $0xd0] sm:$0xff]  ;;  %v489_v56 = vld [vmem:[%s942_s14 + $0xd8] sm:$0xff]  ;;  %s980_s20 = sshll.u32 %s1016_s18, 1  ;;  %s400_s18 = scalar_lea.vmem [#allocation3], %s732_s17 }
  0x36   : > { %v471_v53 = vld [vmem:[%s942_s14 + $0x48] sm:$0xff]  ;;  %v472_v55 = vld [vmem:[%s942_s14 + $0x50] sm:$0xff]  ;;  %v473_v57 = vld [vmem:[%s942_s14 + $0x58] sm:$0xff]  ;;  %s441_s24 = scalar_lea.vmem %s1007_s1, %s980_s20  ;;  %s437_s27 = scalar_lea.vmem %s1006_s0, %s980_s20 }
  0x37   : > { %v490_v58 = vld [vmem:[%s942_s14 + $0xe0] sm:$0xff]  ;;  %v491_v60 = vld [vmem:[%s942_s14 + $0xe8] sm:$0xff]  ;;  %v492_v62 = vld [vmem:[%s942_s14 + $0xf0] sm:$0xff]  ;;  %s446_s30 = scalar_lea.vmem %s1010_s4, %s980_s20 }
  0x38   : > { %528 = vxpose.xlu1.b32.cont [3/16] (narrow) %v480_v38, 8  ;;  %v474_v59 = vld [vmem:[%s942_s14 + $0x60] sm:$0xff]  ;;  %v475_v61 = vld [vmem:[%s942_s14 + $0x68] sm:$0xff]  ;;  %v476_v63 = vld [vmem:[%s942_s14 + $0x70] sm:$0xff] }
  0x39   : > { %496 = vxpose.xlu0.b32.cont [3/16] (narrow) %v464_v39, 8  ;;  %v493_v0 = vld [vmem:[%s942_s14 + $0xf8] sm:$0xff]  ;;  %v448_v2 = vld [vmem:[%s441_s24] sm:$0x3] }
  0x3a   : > { %v477_v1 = vld [vmem:[%s942_s14 + $0x78] sm:$0xff]  ;;  %v447_v3 = vld [vmem:[%s437_s27] sm:$0x3] }
  0x3b   : > { %v449_v4 = vsub.f32 %v447_v3, %v448_v2  ;;  %v571_v13 = vrot.slane %v447_v3, %v570_v12  ;;  %v740_v15 = vld [vmem:[%s400_s18] sm:$0xf]  }
  0x3c   : > { %529 = vxpose.xlu1.b32.cont [4/16] (narrow) %v481_v40, 8  ;;  %v742_v19 = vunpack.c.1.s8 %v740_v15  ;;  %v741_v20 = vunpack.c.0.s8 %v740_v15 }
  0x3d   : > { %497 = vxpose.xlu0.b32.cont [4/16] (narrow) %v465_v41, 8  ;;  %v450_v5 = vmul.f32 %v449_v4, %v449_v4  ;;  %v572_v14 = vcombine.high %v571_v13, %v571_v13  ;;  %v579_v18 = vrot.slane %v571_v13, %v570_v12 }
  0x3e   : > { %v563_v23 = vcvt.s32.f32 %v742_v19  ;;  %v562_v24 = vcvt.s32.f32 %v741_v20 }
  0x3f   : > { %v452_v9 = vsel %vm451_vm0, %v450_v5, 0.0  ;;  %v586_v16 = vrot.slane %v572_v14, %v570_v12  ;;  %v590_v22 = vrot.slane %v579_v18, %v589_v17 }
  0x40   : > { %530 = vxpose.xlu1.b32.cont [5/16] (narrow) %v482_v42, 8 }
  0x41   : > { %498 = vxpose.xlu0.b32.cont [5/16] (narrow) %v466_v43, 8  ;;  %v594_v21 = vrot.slane %v586_v16, %v589_v17 }
  0x44   : > { %531 = vxpose.xlu1.b32.cont [6/16] (narrow) %v483_v44, 8 }
  0x45   : > { %499 = vxpose.xlu0.b32.cont [6/16] (narrow) %v467_v45, 8 }
  0x48   : > { %532 = vxpose.xlu1.b32.cont [7/16] (narrow) %v484_v46, 8 }
  0x49   : > { %500 = vxpose.xlu0.b32.cont [7/16] (narrow) %v468_v47, 8 }
  0x4c   : > { %533 = vxpose.xlu1.b32.cont [8/16] (narrow) %v485_v48, 8 }
  0x4d   : > { %501 = vxpose.xlu0.b32.cont [8/16] (narrow) %v469_v49, 8 }
  0x50   : > { %534 = vxpose.xlu1.b32.cont [9/16] (narrow) %v486_v50, 8 }
  0x51   : > { %502 = vxpose.xlu0.b32.cont [9/16] (narrow) %v470_v51, 8 }
  0x54   : > { %535 = vxpose.xlu1.b32.cont [10/16] (narrow) %v487_v52, 8 }
  0x55   : > { %503 = vxpose.xlu0.b32.cont [10/16] (narrow) %v471_v53, 8 }
  0x58   : > { %536 = vxpose.xlu1.b32.cont [11/16] (narrow) %v488_v54, 8 }
  0x59   : > { %504 = vxpose.xlu0.b32.cont [11/16] (narrow) %v472_v55, 8 }
  0x5c   : > { %537 = vxpose.xlu1.b32.cont [12/16] (narrow) %v489_v56, 8 }
  0x5d   : > { %505 = vxpose.xlu0.b32.cont [12/16] (narrow) %v473_v57, 8 }
  0x60   : > { %538 = vxpose.xlu1.b32.cont [13/16] (narrow) %v490_v58, 8 }
  0x61   : > { %506 = vxpose.xlu0.b32.cont [13/16] (narrow) %v474_v59, 8 }
  0x64   : > { %539 = vxpose.xlu1.b32.cont [14/16] (narrow) %v491_v60, 8 }
  0x65   : > { %507 = vxpose.xlu0.b32.cont [14/16] (narrow) %v475_v61, 8 }
  0x68   : > { %540 = vxpose.xlu1.b32.cont [15/16] (narrow) %v492_v62, 8 }
  0x69   : > { %508 = vxpose.xlu0.b32.cont [15/16] (narrow) %v476_v63, 8 }
  0x6c   : > { %541 = vxpose.xlu1.b32.end [16/16] (narrow) %v493_v0, 8 }
  0x6d   : > { %509 = vxpose.xlu0.b32.end [16/16] (narrow) %v477_v1, 8 }
  0x9a   : > { %453 = vadd.xlane.f32.xlu0 %v452_v9 }
  0xb0   : > { %v542_v25 = vpop.trf.xlu1 }
  0xb1   : > { %v510_v26 = vpop.trf.xlu0  ;;  %v598_v27 = vsub.f32 %v594_v21, %v542_v25 }
  0xb2   : > { %v597_v28 = vsub.f32 %v590_v22, %v510_v26 }
  0xb3   : > { %v600_v29 = vmul.f32 %v598_v27, %v563_v23 }
  0xb4   : > { %v599_v30 = vmul.f32 %v597_v28, %v562_v24 }
  0xb5   : > { %v602_v31 = vmul.f32 %v600_v29, %v600_v29 }
  0xb6   : > { %v601_v32 = vmul.f32 %v599_v30, %v599_v30 }
  0xb8   : > { %v603_v33 = vadd.f32 %v602_v31, %v601_v32 }
  0xba   : > { %604 = vadd.xlane.f32.xlu1 %v603_v33 }
 0x127   : > { %v454_v34 = vpop.xlane.xlu0 %453 }
 0x128   : > { %v455_v35 = vrot.slane %v454_v34, 4 }
 0x12a   : > { %v456_v36 = vadd.f32 %v455_v35, %v454_v34 }
 0x12c   : > { %v457_v37 = vrot.slane %v456_v36, 2 }
 0x12e   : > { %v458_v38 = vadd.f32 %v457_v37, %v456_v36 }
 0x130   : > { %v459_v39 = vrot.slane %v458_v38, 1 }
 0x132   : > { %v460_v40 = vadd.f32 %v459_v39, %v458_v38 }
 0x134   : > { %743 = vpush %v460_v40 }
 0x147   : > { %v605_v41 = vpop.xlane.xlu1 %604 }
 0x148   : > { %v606_v42 = vrot.slane %v605_v41, 4 }
 0x14a   : > { %v607_v43 = vadd.f32 %v606_v42, %v605_v41 }
 0x14c   : > { %v608_v44 = vrot.slane %v607_v43, 2 }
 0x14e   : > { %v609_v45 = vadd.f32 %v608_v44, %v607_v43 }
 0x150   : > { %v610_v46 = vrot.slane %v609_v45, 1 }
 0x152   : > { %v611_v47 = vadd.f32 %v610_v46, %v609_v45 }
 0x154   : > { %745 = vpush %v611_v47 }
 0x165   : > { %s744_s15 = spop %743 }
 0x166   : > { %v616_v48 = vstv %s744_s15 }
 0x185   : > { %s746_s5 = spop %745 }
 0x186   : > { %v617_v49 = vstv %s746_s5 }
 0x187   : > { %v618_v50 = vsel %vm615_vm1, %v616_v48, %v617_v49 }
 0x188   : > { %619 = vst [vmem:[%s446_s30] sm:$0x3] %v618_v50 }
 0x189 PF: > { %p11_p9 = scmp.ge.s32.totalorder %s839_s19, 4   ;;  %s1012_s15 = smov %s790_s16 }
 0x18a   : > { %s1013_s16 = smov %s848_s22  ;;  %s1014_s17 = smov %s839_s19 }
 0x18b   :  { %13 = sbr.rel (!%p11_p9) target bundleno = 2 (0x2), region = 157 }

</bundles_post_ra>
